<compile_context>
chip_gen: v5e
topology: v5e:2x2
jax: 0.10.0
libtpu: 0.0.40
codegen_flags: <defaults>
</compile_context>

<pallas_src>
import jax
import jax.numpy as jnp
from jax import lax
from jax.experimental import pallas as pl
from jax.experimental.pallas import tpu as pltpu


def _round_up(n, m):
    return ((n + m - 1) // m) * m


# ----------------------------------------------------------------------------
# Kernel 1: M-tiled matmul + bias (lane-dense output).  Used for both the
# time-hoisted input projection U and the time-collapsed output projection V.
# ----------------------------------------------------------------------------
def matmul_bias_kernel(x_ref, w_ref, b_ref, o_ref):
    o_ref[...] = (
        jnp.dot(x_ref[...], w_ref[...], preferred_element_type=jnp.float32)
        + b_ref[...]
    )


def matmul_bias(x, w, b, *, tile_m=256):
    """x: (M, K) f32, w: (K, N) f32 (N lane-padded), b: (1, N) f32 -> (M, N) f32."""
    M, K = x.shape
    N = w.shape[1]
    tm = min(tile_m, M)
    Mp = _round_up(M, tm)
    if Mp != M:
        x = jnp.zeros((Mp, K), x.dtype).at[:M].set(x)
    # TODO(synk): for vocab-scale N additionally tile the N axis and set
    # vmem_limit_bytes (v7x has only 64 MiB physical VMEM).
    out = pl.pallas_call(
        matmul_bias_kernel,
        out_shape=jax.ShapeDtypeStruct((Mp, N), jnp.float32),
        grid_spec=pltpu.PrefetchScalarGridSpec(
            num_scalar_prefetch=0,
            grid=(Mp // tm,),
            in_specs=[
                pl.BlockSpec((tm, K), lambda i: (i, 0)),   # activations, tiled on M
                pl.BlockSpec((K, N), lambda i: (0, 0)),    # weight, resident in VMEM
                pl.BlockSpec((1, N), lambda i: (0, 0)),    # bias, resident in VMEM
            ],
            out_specs=pl.BlockSpec((tm, N), lambda i: (i, 0)),
        ),
        compiler_params=pltpu.CompilerParams(
            dimension_semantics=("parallel",),   # independent M tiles (megacore on v7x)
        ),
    )(x, w, b)
    return out[:M] if Mp != M else out


# ----------------------------------------------------------------------------
# Kernel 2: the serial recurrence, time axis chunked into blocks of Tb steps.
#   h_t = tanh(hid1_t + h_{t-1} @ W)   with hid1_t = x_t @ U + (u_b + w_b).
# ----------------------------------------------------------------------------
def rnn_recurrence_kernel(hid1_ref, h0_ref, w_ref, hs_ref, h_carry):
    @pl.when(pl.program_id(0) == 0)
    def _():
        h_carry[...] = h0_ref[...]

    tb = hid1_ref.shape[0]  # static chunk length

    def step(i, h):
        h_new = jnp.tanh(
            hid1_ref[i]
            + jnp.dot(h, w_ref[...], preferred_element_type=jnp.float32)
        )
        hs_ref[i] = h_new        # per-step hidden written out (lane-dense)
        return h_new

    # Hidden state carried in registers within the chunk; only the chunk-boundary
    # value round-trips through the VMEM scratch.
    h_last = lax.fori_loop(0, tb, step, h_carry[...], unroll=True)
    h_carry[...] = h_last


# ----------------------------------------------------------------------------
# One-time parameter preparation (hoisted out of the forward pass).
# ----------------------------------------------------------------------------
def prepare_rnn_params(u_w, u_b, w_w, w_b, v_w, v_b):
    I, H = u_w.shape
    O = v_w.shape[1]
    Hp = _round_up(H, 128)
    Op = _round_up(O, 128)
    f32 = jnp.float32
    return {
        "u_w": jnp.zeros((I, Hp), f32).at[:, :H].set(u_w.astype(f32)),
        # Both biases fused into the (time-parallel) input projection.
        "ub": jnp.zeros((1, Hp), f32).at[0, :H].set((u_b + w_b).astype(f32)),
        "w_w": jnp.zeros((Hp, Hp), f32).at[:H, :H].set(w_w.astype(f32)),
        "v_w": jnp.zeros((Hp, Op), f32).at[:H, :O].set(v_w.astype(f32)),
        "v_b": jnp.zeros((1, Op), f32).at[0, :O].set(v_b.astype(f32)),
        "I": I, "H": H, "O": O, "Hp": Hp, "Op": Op,
    }


def rnn_forward_sequence(xs, h0, params, *, time_block=32, tile_m=256):
    """Run the RNN cell over a whole sequence.

    xs: (T, B, input_size), h0: (B, hidden_size).
    Returns (outputs (T, B, output_size), hiddens (T, B, hidden_size));
    hiddens[t] is the hidden state after step t (hiddens[-1] == final hidden).
    Eval-mode dropout == identity.
    """
    T, B, I = xs.shape
    H, O, Hp, Op = params["H"], params["O"], params["Hp"], params["Op"]
    assert I == params["I"]

    f32 = jnp.float32
    Bp = _round_up(max(B, 1), 8)          # sublane multiple
    Tb = min(time_block, T)               # timesteps per recurrence grid step
    Tp = _round_up(T, Tb)

    # Activation padding only (padded rows/cols are exact zeros and sliced away).
    # The input feature dim I is NOT lane-padded: it is only a contraction dim.
    xs_p = jnp.zeros((Tp, Bp, I), f32).at[:T, :B, :].set(xs.astype(f32))
    h0_p = jnp.zeros((Bp, Hp), f32).at[:B, :H].set(h0.astype(f32))

    # 1) Input projection hoisted off the serial path: one M-tiled matmul over all t.
    hid1 = matmul_bias(
        xs_p.reshape(Tp * Bp, I), params["u_w"], params["ub"], tile_m=tile_m
    ).reshape(Tp, Bp, Hp)

    # 2) Serial recurrence; W stays resident in VMEM, time chunked into Tb-blocks.
    hs_p = pl.pallas_call(
        rnn_recurrence_kernel,
        out_shape=jax.ShapeDtypeStruct((Tp, Bp, Hp), f32),
        grid_spec=pltpu.PrefetchScalarGridSpec(
            num_scalar_prefetch=0,
            grid=(Tp // Tb,),
            in_specs=[
                pl.BlockSpec((Tb, Bp, Hp), lambda c: (c, 0, 0)),   # hid1 chunk
                pl.BlockSpec((Bp, Hp), lambda c: (0, 0)),          # h0 (resident)
                pl.BlockSpec((Hp, Hp), lambda c: (0, 0)),          # W (resident)
            ],
            out_specs=pl.BlockSpec((Tb, Bp, Hp), lambda c: (c, 0, 0)),
            scratch_shapes=[pltpu.VMEM((Bp, Hp), f32)],            # chunk-boundary h
        ),
        compiler_params=pltpu.CompilerParams(
            dimension_semantics=("arbitrary",),    # time axis is inherently serial
        ),
    )(hid1, h0_p, params["w_w"])

    # 3) Output projection V with T*B collapsed into the matmul M dimension.
    hs_real = hs_p[:T]
    out_p = matmul_bias(
        hs_real.reshape(T * Bp, Hp), params["v_w"], params["v_b"], tile_m=tile_m
    ).reshape(T, Bp, Op)

    # TODO(synk): training-mode Dropout(p=0.1) omitted (eval-mode == identity); it
    # would need pltpu.prng_seed/prng_random_bits masking with a per-step seed.
    return out_p[:, :B, :O], hs_real[:, :B, :H]


def rnn_forward(x, h, params):
    """Single-step API matching RNN.forward(input, hidden) -> (output, new_hidden)."""
    out, hs = rnn_forward_sequence(x[None], h, params, time_block=1)
    return out[0], hs[0]


def init_linear_params(key, in_features, out_features):
    """Deterministic init mimicking nn.Linear: uniform(-1/sqrt(in), 1/sqrt(in)).
    Weight is stored as (in_features, out_features) (pre-transposed)."""
    k_w, k_b = jax.random.split(key)
    bound = 1.0 / jnp.sqrt(jnp.float32(in_features))
    w = jax.random.uniform(k_w, (in_features, out_features),
                           dtype=jnp.float32, minval=-bound, maxval=bound)
    b = jax.random.uniform(k_b, (out_features,),
                           dtype=jnp.float32, minval=-bound, maxval=bound)
    return w, b


if __name__ == "__main__":
    # Small shapes consistent with the RNN cell.
    seq_len = 8
    batch = 2
    input_size = 16      # embedding / input feature dim
    hidden_size = 32
    output_size = 48     # vocab-ish output dim

    key = jax.random.PRNGKey(0)
    k_x, k_h, k_u, k_w, k_v = jax.random.split(key, 5)

    xs = jax.random.normal(k_x, (seq_len, batch, input_size), dtype=jnp.float32)
    h0 = jax.random.uniform(k_h, (batch, hidden_size), dtype=jnp.float32)  # like initHidden()

    u_w, u_b = init_linear_params(k_u, input_size, hidden_size)    # U: in -> hidden
    w_w, w_b = init_linear_params(k_w, hidden_size, hidden_size)   # W: hidden -> hidden
    v_w, v_b = init_linear_params(k_v, hidden_size, output_size)   # V: hidden -> out

    params = prepare_rnn_params(u_w, u_b, w_w, w_b, v_w, v_b)      # one-time prep

    outs, hiddens = rnn_forward_sequence(xs, h0, params)
    outs = jax.block_until_ready(outs)
    hiddens = jax.block_until_ready(hiddens)

    # Pure-JAX reference: step-by-step cell (eval-mode dropout == identity).
    hp = jax.lax.Precision.HIGHEST
    h_state = h0
    outs_ref, hs_ref = [], []
    for t in range(seq_len):
        hid1 = jnp.dot(xs[t], u_w, precision=hp) + u_b
        hid2 = jnp.dot(h_state, w_w, precision=hp) + w_b
        h_state = jnp.tanh(hid1 + hid2)
        hs_ref.append(h_state)
        outs_ref.append(jnp.dot(h_state, v_w, precision=hp) + v_b)
    outs_ref = jnp.stack(outs_ref)
    hs_ref = jnp.stack(hs_ref)

    assert outs.shape == (seq_len, batch, output_size)
    assert hiddens.shape == (seq_len, batch, hidden_size)
    assert jnp.allclose(outs, outs_ref, atol=1e-4, rtol=1e-4), \
        float(jnp.max(jnp.abs(outs - outs_ref)))
    assert jnp.allclose(hiddens, hs_ref, atol=1e-4, rtol=1e-4), \
        float(jnp.max(jnp.abs(hiddens - hs_ref)))

    # Single-step API parity (matches forward(input, hidden) of the nn.Module).
    out1, h1 = rnn_forward(xs[0], h0, params)
    out1 = jax.block_until_ready(out1)
    assert jnp.allclose(out1, outs_ref[0], atol=1e-4, rtol=1e-4)
    assert jnp.allclose(h1, hs_ref[0], atol=1e-4, rtol=1e-4)

    print("KERNEL_OK")
</pallas_src>

<mosaic_0001>
module attributes {stable_mosaic.version = 11 : i64} {
  func.func @matmul_bias_kernel(%arg0: i32, %arg1: memref<64x16xf32, #tpu.memory_space<vmem>>, %arg2: memref<16x128xf32, #tpu.memory_space<vmem>>, %arg3: memref<1x128xf32, #tpu.memory_space<vmem>>, %arg4: memref<64x128xf32, #tpu.memory_space<vmem>>) attributes {dimension_semantics = [#tpu.dimension_semantics<parallel>], iteration_bounds = array<i64: 1>, scalar_prefetch = 0 : i64, scratch_operands = 0 : i64, tpu.core_type = #tpu.core_type<tc>, window_params = [{transform_indices = @transform_0, window_bounds = array<i64: 64, 16>}, {pipeline_mode = #tpu.pipeline_mode<synchronous>, transform_indices = @transform_1, window_bounds = array<i64: 16, 128>}, {pipeline_mode = #tpu.pipeline_mode<synchronous>, transform_indices = @transform_2, window_bounds = array<i64: 1, 128>}, {transform_indices = @transform_3, window_bounds = array<i64: 64, 128>}]} {
    %c0 = arith.constant 0 : index
    %c0_0 = arith.constant 0 : index
    %0 = vector.load %arg1[%c0, %c0_0] : memref<64x16xf32, #tpu.memory_space<vmem>>, vector<64x16xf32>
    %c0_1 = arith.constant 0 : index
    %c0_2 = arith.constant 0 : index
    %1 = vector.load %arg2[%c0_1, %c0_2] : memref<16x128xf32, #tpu.memory_space<vmem>>, vector<16x128xf32>
    %cst = arith.constant dense<0.000000e+00> : vector<64x128xf32>
    %2 = tpu.matmul %0, %1, %cst {dimension_numbers = #tpu.dot_dimension_numbers<[1], [0], [0], [1], [0, 0, 1, 1], [], []>} : vector<64x16xf32>, vector<16x128xf32>, vector<64x128xf32> -> vector<64x128xf32>
    %c0_3 = arith.constant 0 : index
    %c0_4 = arith.constant 0 : index
    %3 = vector.load %arg3[%c0_3, %c0_4] : memref<1x128xf32, #tpu.memory_space<vmem>>, vector<1x128xf32>
    %4 = vector.broadcast %3 : vector<1x128xf32> to vector<64x128xf32>
    %5 = arith.addf %2, %4 : vector<64x128xf32>
    %c0_5 = arith.constant 0 : index
    %c0_6 = arith.constant 0 : index
    %6 = vector.load %arg4[%c0_5, %c0_6] : memref<64x128xf32, #tpu.memory_space<vmem>>, vector<64x128xf32>
    tpu.vector_store %arg4[%c0_5, %c0_6], %5 {strides = array<i32>} : memref<64x128xf32, #tpu.memory_space<vmem>>, vector<64x128xf32>,
    return
  }
  func.func @transform_0(%arg0: i32) -> (i32, i32) {
    %c0_i32 = arith.constant 0 : i32
    %c0_i32_0 = arith.constant 0 : i32
    return %arg0, %c0_i32 : i32, i32
  }
  func.func @transform_1(%arg0: i32) -> (i32, i32) {
    %c0_i32 = arith.constant 0 : i32
    %c0_i32_0 = arith.constant 0 : i32
    %c0_i32_1 = arith.constant 0 : i32
    return %c0_i32, %c0_i32_0 : i32, i32
  }
  func.func @transform_2(%arg0: i32) -> (i32, i32) {
    %c0_i32 = arith.constant 0 : i32
    %c0_i32_0 = arith.constant 0 : i32
    %c0_i32_1 = arith.constant 0 : i32
    return %c0_i32, %c0_i32_0 : i32, i32
  }
  func.func @transform_3(%arg0: i32) -> (i32, i32) {
    %c0_i32 = arith.constant 0 : i32
    %c0_i32_0 = arith.constant 0 : i32
    return %arg0, %c0_i32 : i32, i32
  }
}

</mosaic_0001>

<bundles_post_ra>
// kernel: tpu_custom_call.1
= control target key start
LH: loop header
LB: loop body
LE: loop exit
PB: predicated region body
PF: predicated region fallthrough
CT: control target
= control target key end

     0   :  { %vm29_vm0 = vcmask 130048   ;;  %s232_s0 = inlined_call_operand.vmem [shape: f32[64,16], index: 0, kind: input, shape index: {}]   ;;  %s233_s1 = inlined_call_operand.vmem [shape: f32[16,128], index: 1, kind: input, shape index: {}]   ;;  %s234_s2 = inlined_call_operand.vmem [shape: f32[1,128], index: 2, kind: input, shape index: {}]   ;;  %s235_s3 = inlined_call_operand.hbm [shape: f32[64,128], index: 3, kind: output, shape index: {}]  }
   0x1   :  { %v24_v0 = vld [vmem:[%s233_s1 + $0x8] sm:$0xff]  ;;  %v23_v1 = vld [vmem:[%s233_s1] sm:$0xff]  ;;  %v21_v3 = vld [vmem:[%s232_s0 + $0x30] sm:$0xff] }
   0x2   :  { %130 = vmatpush.msra.mxu2 %v24_v0  ;;  %131 = vmatpush.msra.mxu3 %v24_v0  ;;  %v19_v2 = vld [vmem:[%s232_s0 + $0x20] sm:$0xff]  ;;  %v17_v5 = vld [vmem:[%s232_s0 + $0x10] sm:$0xff] }
   0x3   :  { %68 = vmatpush.msra.mxu0 %v24_v0  ;;  %129 = vmatpush.msra.mxu1 %v24_v0  ;;  %v15_v4 = vld [vmem:[%s232_s0] sm:$0xff] }
   0x4   :  { %133 = vmatpush.msra.mxu2 %v23_v1  ;;  %134 = vmatpush.msra.mxu3 %v23_v1 }
   0x5   :  { %125 = vmatmul.msk.f32.vlgmr.msra.gmra.mxu2 %vm29_vm0, %v19_v2  ;;  %127 = vmatmul.msk.f32.vlgmr.msra.gmra.mxu3 %vm29_vm0, %v21_v3 }
   0x6   :  { %8 = vsyncpa [#allocation3], 0  ;;  %69 = vmatpush.msra.mxu0 %v23_v1  ;;  %132 = vmatpush.msra.mxu1 %v23_v1  ;;  %v20_v6 = vld [vmem:[%s232_s0 + $0x28] sm:$0xff]  ;;  %v22_v7 = vld [vmem:[%s232_s0 + $0x38] sm:$0xff]  ;;  %s109_s8 = sshll.u32 %s235_s3, 4  ;;  %s166_s9 = smov 128   ;;  %s110_s8 = int_to_ptr.hbm [resolvable:$true] %s109_s8 }
   0x7   :  { %121 = vmatmul.msk.f32.vlgmr.msra.gmra.mxu0 %vm29_vm0, %v15_v4  ;;  %123 = vmatmul.msk.f32.vlgmr.msra.gmra.mxu1 %vm29_vm0, %v17_v5  ;;  %v16_v8 = vld [vmem:[%s232_s0 + $0x8] sm:$0xff]  ;;  %v18_v9 = vld [vmem:[%s232_s0 + $0x18] sm:$0xff]  ;;  %v138_v10 = vld [vmem:[%s234_s2] ss:$0 sm:$0xff]  ;;  %s165_s0 = smov [#allocation2]   ;;  %s167_s10 = smov 8  }
   0x8   :  { %s107_s6 = sshll.u32 %s165_s0, 4  ;;  %s108_s6 = int_to_ptr.vmem [resolvable:$true] %s107_s6 }
   0xd   :  { %126 = vmatmul.msk.f32.gmra.mxu2 %vm29_vm0, %v20_v6  ;;  %128 = vmatmul.msk.f32.gmra.mxu3 %vm29_vm0, %v22_v7 }
   0xf   :  { %122 = vmatmul.msk.f32.gmra.mxu0 %vm29_vm0, %v16_v8  ;;  %124 = vmatmul.msk.f32.gmra.mxu1 %vm29_vm0, %v18_v9 }
  0x84   :  { %v71_v11 = vpop.f32.mrf.mxu0  ;;  %v77_v12 = vpop.f32.mrf.mxu1 }
  0x85   :  { %v72_v13 = vadd.f32 %v138_v10, %v71_v11  ;;  %v78_v14 = vadd.f32 %v138_v10, %v77_v12 }
  0x87   :  { %95 = vst [vmem:[#allocation2] sm:$0xff] %v72_v13 }
  0x88   :  { %97 = vst [vmem:[#allocation2 + $0x10] sm:$0xff] %v78_v14  ;;  %v83_v15 = vpop.f32.mrf.mxu2  ;;  %v89_v16 = vpop.f32.mrf.mxu3 }
  0x89   :  { %v84_v17 = vadd.f32 %v138_v10, %v83_v15  ;;  %v90_v18 = vadd.f32 %v138_v10, %v89_v16 }
  0x8b   :  { %99 = vst [vmem:[#allocation2 + $0x20] sm:$0xff] %v84_v17 }
  0x8c   :  { %101 = vst [vmem:[#allocation2 + $0x30] sm:$0xff] %v90_v18  ;;  %v74_v19 = vpop.f32.mrf.mxu0  ;;  %v80_v20 = vpop.f32.mrf.mxu1 }
  0x8d   :  { %v75_v21 = vadd.f32 %v138_v10, %v74_v19  ;;  %v81_v22 = vadd.f32 %v138_v10, %v80_v20 }
  0x8f   :  { %96 = vst [vmem:[#allocation2 + $0x8] sm:$0xff] %v75_v21 }
  0x90   :  { %98 = vst [vmem:[#allocation2 + $0x18] sm:$0xff] %v81_v22  ;;  %v86_v23 = vpop.f32.mrf.mxu2  ;;  %v92_v24 = vpop.f32.mrf.mxu3 }
  0x91   :  { %v87_v25 = vadd.f32 %v138_v10, %v86_v23  ;;  %v93_v26 = vadd.f32 %v138_v10, %v92_v24 }
  0x93   :  { %100 = vst [vmem:[#allocation2 + $0x28] sm:$0xff] %v87_v25 }
  0x94   :  { %102 = vst [vmem:[#allocation2 + $0x38] sm:$0xff] %v93_v26 }
  0x95   :  { %115 = dma.vmem_to_hbm [thread:$0]  %s108_s6, 1024, %s110_s8, [#allocation3], %s166_s9, %s166_s9, %s167_s10  }
  0x96   :  { %163 = dma.done.wait [#allocation3], 1024  }
  0x97   :  { %164 = vsyncadd [#allocation3], 4294966272 }
  0x98   :  { %120 = vsyncpa [#allocation3], 1 }

</bundles_post_ra>
